<compile_context>
chip_gen: v5e
topology: v5e:2x2
jax: 0.10.0
libtpu: 0.0.40
codegen_flags: <defaults>
</compile_context>

<pallas_src>
import math

import jax
import jax.numpy as jnp
from jax.experimental import pallas as pl
from jax.experimental.pallas import tpu as pltpu

_COLS = 512          # lane-dense last dim (multiple of 128)
_MAX_TILE_ROWS = 512 # 512 x 512 f32 = 1 MiB per output tile


def _hash_u32(x):
    """lowbias32 integer avalanche hash (all uint32 arithmetic, VPU-only)."""
    x = x ^ (x >> jnp.uint32(16))
    x = x * jnp.uint32(0x7FEB352D)
    x = x ^ (x >> jnp.uint32(15))
    x = x * jnp.uint32(0x846CA68B)
    x = x ^ (x >> jnp.uint32(16))
    return x


def _gen_noise_kernel(seed_ref, o_ref):
    tile_rows, cols = o_ref.shape

    # Global flat index of each element of this tile in the padded slab.
    row = jax.lax.broadcasted_iota(jnp.int32, (tile_rows, cols), 0)
    col = jax.lax.broadcasted_iota(jnp.int32, (tile_rows, cols), 1)
    local_idx = (row * cols + col).astype(jnp.uint32)
    base = pl.program_id(0).astype(jnp.uint32) * jnp.uint32(tile_rows * cols)
    seed = seed_ref[0].astype(jnp.uint32)

    # Counter-based key: unique per element, mixed with the seed.
    key = (base + local_idx) * jnp.uint32(0x9E3779B9) + seed * jnp.uint32(0x85EBCA6B)
    bits1 = _hash_u32(key ^ jnp.uint32(0x3C6EF372))
    bits2 = _hash_u32(key ^ jnp.uint32(0xDAA66D2B))

    # uint32 -> uniform float32 in [0, 1) via the exponent trick (no int->float
    # convert, just bit ops + one subtract).
    one_bits = jnp.uint32(0x3F800000)
    u1 = jax.lax.bitcast_convert_type((bits1 >> jnp.uint32(9)) | one_bits,
                                      jnp.float32) - 1.0
    u2 = jax.lax.bitcast_convert_type((bits2 >> jnp.uint32(9)) | one_bits,
                                      jnp.float32) - 1.0

    # Box-Muller in float32; (1 - u1) is in (0, 1], so the log is finite.
    r = jnp.sqrt(-2.0 * jnp.log(1.0 - u1))
    theta = jnp.float32(2.0 * math.pi) * u2
    o_ref[...] = (r * jnp.cos(theta)).astype(o_ref.dtype)


def _round_up(x, m):
    return (x + m - 1) // m * m


def gen_noise(x, dim2, seed=0):
    """Pallas port of GenNoise.forward.

    Returns N(0, 1) noise of shape (x.shape[0], dim2, *x.shape[2:]) with x's
    dtype.  Input values are unused (matching the PyTorch module).
    """
    out_dims = (x.shape[0], dim2) + tuple(x.shape[2:])
    total = math.prod(out_dims)

    # Lane-dense padded slab: (rows_padded, _COLS), tiled over rows.
    rows = -(-total // _COLS)
    tile_rows = min(_MAX_TILE_ROWS, _round_up(rows, 8))
    rows_padded = _round_up(rows, tile_rows)
    grid = (rows_padded // tile_rows,)

    n_padded = rows_padded * _COLS
    out_bytes = n_padded * jnp.dtype(x.dtype).itemsize
    seed_arr = jnp.asarray([seed], dtype=jnp.int32)

    flat = pl.pallas_call(
        _gen_noise_kernel,
        out_shape=jax.ShapeDtypeStruct((rows_padded, _COLS), x.dtype),
        grid=grid,
        in_specs=[pl.BlockSpec(memory_space=pltpu.MemorySpace.SMEM)],
        out_specs=pl.BlockSpec((tile_rows, _COLS), lambda i: (i, 0)),
        compiler_params=pltpu.CompilerParams(
            dimension_semantics=("parallel",)),
        cost_estimate=pl.CostEstimate(
            flops=20 * n_padded,
            transcendentals=3 * n_padded,
            bytes_accessed=out_bytes),
    )(seed_arr)

    # Layout plumbing (strip lane-padding, restore NCW) stays in plain JAX.
    return flat.reshape(-1)[:total].reshape(out_dims)


if __name__ == "__main__":
    key = jax.random.PRNGKey(0)
    # common1D -> NCW input: batch=2, channels=4, width=16.
    x = jax.random.normal(key, (2, 4, 16), dtype=jnp.float32)
    dim2 = 8

    out = gen_noise(x, dim2, seed=0)
    out = jax.block_until_ready(out)

    # Shape has dim 1 replaced by dim2, dtype matches input, output is
    # genuinely random (not a constant fill) and finite.
    assert out.shape == (x.shape[0], dim2, x.shape[2]), out.shape
    assert out.dtype == x.dtype, out.dtype
    assert bool(jnp.all(jnp.isfinite(out)))
    assert float(jnp.std(out)) > 0.1
    assert float(jnp.abs(jnp.mean(out))) < 0.5

    print("KERNEL_OK")
</pallas_src>

<mosaic_0001>
module attributes {stable_mosaic.version = 11 : i64} {
  func.func @_gen_noise_kernel(%arg0: i32, %arg1: memref<1xi32, #tpu.memory_space<smem>>, %arg2: memref<8x512xf32, #tpu.memory_space<vmem>>) attributes {dimension_semantics = [#tpu.dimension_semantics<parallel>], iteration_bounds = array<i64: 1>, scalar_prefetch = 0 : i64, scratch_operands = 0 : i64, tpu.core_type = #tpu.core_type<tc>, window_params = [{transform_indices = @transform_0, window_bounds = array<i64: 1>}, {transform_indices = @transform_1, window_bounds = array<i64: 8, 512>}]} {
    %0 = tpu.iota {dimensions = array<i32: 0>} : vector<8x512xi32>
    %1 = tpu.iota {dimensions = array<i32: 1>} : vector<8x512xi32>
    %c512_i32 = arith.constant 512 : i32
    %2 = vector.broadcast %c512_i32 : i32 to vector<8x512xi32>
    %3 = arith.muli %0, %2 : vector<8x512xi32>
    %4 = arith.addi %3, %1 : vector<8x512xi32>
    %c4096_i32 = arith.constant 4096 : i32
    %5 = arith.muli %arg0, %c4096_i32 : i32
    %c0 = arith.constant 0 : index
    %6 = memref.load %arg1[%c0] : memref<1xi32, #tpu.memory_space<smem>>
    %7 = vector.broadcast %5 : i32 to vector<8x512xi32>
    %8 = arith.addi %7, %4 : vector<8x512xi32>
    %c-1640531527_i32 = arith.constant -1640531527 : i32
    %9 = vector.broadcast %c-1640531527_i32 : i32 to vector<8x512xi32>
    %10 = arith.muli %8, %9 : vector<8x512xi32>
    %c-2048144789_i32 = arith.constant -2048144789 : i32
    %11 = arith.muli %6, %c-2048144789_i32 : i32
    %12 = vector.broadcast %11 : i32 to vector<8x512xi32>
    %13 = arith.addi %10, %12 : vector<8x512xi32>
    %c1013904242_i32 = arith.constant 1013904242 : i32
    %14 = vector.broadcast %c1013904242_i32 : i32 to vector<8x512xi32>
    %15 = arith.xori %13, %14 : vector<8x512xi32>
    %c16_i32 = arith.constant 16 : i32
    %16 = vector.broadcast %c16_i32 : i32 to vector<8x512xi32>
    %17 = arith.shrui %15, %16 : vector<8x512xi32>
    %18 = arith.xori %15, %17 : vector<8x512xi32>
    %c2146121005_i32 = arith.constant 2146121005 : i32
    %19 = vector.broadcast %c2146121005_i32 : i32 to vector<8x512xi32>
    %20 = arith.muli %18, %19 : vector<8x512xi32>
    %c15_i32 = arith.constant 15 : i32
    %21 = vector.broadcast %c15_i32 : i32 to vector<8x512xi32>
    %22 = arith.shrui %20, %21 : vector<8x512xi32>
    %23 = arith.xori %20, %22 : vector<8x512xi32>
    %c-2073254261_i32 = arith.constant -2073254261 : i32
    %24 = vector.broadcast %c-2073254261_i32 : i32 to vector<8x512xi32>
    %25 = arith.muli %23, %24 : vector<8x512xi32>
    %c16_i32_0 = arith.constant 16 : i32
    %26 = vector.broadcast %c16_i32_0 : i32 to vector<8x512xi32>
    %27 = arith.shrui %25, %26 : vector<8x512xi32>
    %28 = arith.xori %25, %27 : vector<8x512xi32>
    %c-626627285_i32 = arith.constant -626627285 : i32
    %29 = vector.broadcast %c-626627285_i32 : i32 to vector<8x512xi32>
    %30 = arith.xori %13, %29 : vector<8x512xi32>
    %c16_i32_1 = arith.constant 16 : i32
    %31 = vector.broadcast %c16_i32_1 : i32 to vector<8x512xi32>
    %32 = arith.shrui %30, %31 : vector<8x512xi32>
    %33 = arith.xori %30, %32 : vector<8x512xi32>
    %c2146121005_i32_2 = arith.constant 2146121005 : i32
    %34 = vector.broadcast %c2146121005_i32_2 : i32 to vector<8x512xi32>
    %35 = arith.muli %33, %34 : vector<8x512xi32>
    %c15_i32_3 = arith.constant 15 : i32
    %36 = vector.broadcast %c15_i32_3 : i32 to vector<8x512xi32>
    %37 = arith.shrui %35, %36 : vector<8x512xi32>
    %38 = arith.xori %35, %37 : vector<8x512xi32>
    %c-2073254261_i32_4 = arith.constant -2073254261 : i32
    %39 = vector.broadcast %c-2073254261_i32_4 : i32 to vector<8x512xi32>
    %40 = arith.muli %38, %39 : vector<8x512xi32>
    %c16_i32_5 = arith.constant 16 : i32
    %41 = vector.broadcast %c16_i32_5 : i32 to vector<8x512xi32>
    %42 = arith.shrui %40, %41 : vector<8x512xi32>
    %43 = arith.xori %40, %42 : vector<8x512xi32>
    %c9_i32 = arith.constant 9 : i32
    %44 = vector.broadcast %c9_i32 : i32 to vector<8x512xi32>
    %45 = arith.shrui %28, %44 : vector<8x512xi32>
    %c1065353216_i32 = arith.constant 1065353216 : i32
    %46 = vector.broadcast %c1065353216_i32 : i32 to vector<8x512xi32>
    %47 = arith.ori %45, %46 : vector<8x512xi32>
    %48 = tpu.bitcast %47 : vector<8x512xi32> -> vector<8x512xf32>
    %cst = arith.constant 1.000000e+00 : f32
    %49 = vector.broadcast %cst : f32 to vector<8x512xf32>
    %50 = arith.subf %48, %49 : vector<8x512xf32>
    %c9_i32_6 = arith.constant 9 : i32
    %51 = vector.broadcast %c9_i32_6 : i32 to vector<8x512xi32>
    %52 = arith.shrui %43, %51 : vector<8x512xi32>
    %c1065353216_i32_7 = arith.constant 1065353216 : i32
    %53 = vector.broadcast %c1065353216_i32_7 : i32 to vector<8x512xi32>
    %54 = arith.ori %52, %53 : vector<8x512xi32>
    %55 = tpu.bitcast %54 : vector<8x512xi32> -> vector<8x512xf32>
    %cst_8 = arith.constant 1.000000e+00 : f32
    %56 = vector.broadcast %cst_8 : f32 to vector<8x512xf32>
    %57 = arith.subf %55, %56 : vector<8x512xf32>
    %cst_9 = arith.constant 1.000000e+00 : f32
    %58 = vector.broadcast %cst_9 : f32 to vector<8x512xf32>
    %59 = arith.subf %58, %50 : vector<8x512xf32>
    %60 = math.log %59 : vector<8x512xf32>
    %cst_10 = arith.constant -2.000000e+00 : f32
    %61 = vector.broadcast %cst_10 : f32 to vector<8x512xf32>
    %62 = arith.mulf %61, %60 : vector<8x512xf32>
    %63 = math.sqrt %62 : vector<8x512xf32>
    %cst_11 = arith.constant 6.28318548 : f32
    %64 = vector.broadcast %cst_11 : f32 to vector<8x512xf32>
    %65 = arith.mulf %64, %57 : vector<8x512xf32>
    %66 = math.cos %65 : vector<8x512xf32>
    %67 = arith.mulf %63, %66 : vector<8x512xf32>
    %c0_12 = arith.constant 0 : index
    %c0_13 = arith.constant 0 : index
    %68 = vector.load %arg2[%c0_12, %c0_13] : memref<8x512xf32, #tpu.memory_space<vmem>>, vector<8x512xf32>
    tpu.vector_store %arg2[%c0_12, %c0_13], %67 {strides = array<i32>} : memref<8x512xf32, #tpu.memory_space<vmem>>, vector<8x512xf32>,
    return
  }
  func.func @transform_0(%arg0: i32) -> i32 {
    %c0_i32 = arith.constant 0 : i32
    %c0_i32_0 = arith.constant 0 : i32
    return %c0_i32 : i32
  }
  func.func @transform_1(%arg0: i32) -> (i32, i32) {
    %c0_i32 = arith.constant 0 : i32
    %c0_i32_0 = arith.constant 0 : i32
    return %arg0, %c0_i32 : i32, i32
  }
}

</mosaic_0001>

<bundles_post_ra>
// kernel: tpu_custom_call.1
= control target key start
LH: loop header
LB: loop body
LE: loop exit
PB: predicated region body
PF: predicated region fallthrough
CT: control target
= control target key end

     0   :  { %7 = vsyncpa [#allocation4], 0  ;;  %v10_v0 = vlaneseq  ;;  %s1515_s0 = inlined_call_operand.<no memory space> [shape: s32[1], index: 0, kind: input, shape index: {}]   ;;  %s1516_s1 = inlined_call_operand.hbm [shape: f32[8,512], index: 1, kind: output, shape index: {}]  }
   0x1   :  { %s33_s8 = smul.u32 2246822507, %s1515_s0  ;;  %s928_s0 = smov [#allocation3]  }
   0x2   :  { %v11_v1 = vshrl.u32 %v10_v0, 7  ;;  %v13_v2 = vand.u32 127, %v10_v0  ;;  %s840_s9 = sshll.u32 %s928_s0, 4  ;;  %s842_s12 = sshll.u32 %s1516_s1, 4  ;;  %s841_s9 = int_to_ptr.vmem [resolvable:$true] %s840_s9  ;;  %s843_s12 = int_to_ptr.hbm [resolvable:$true] %s842_s12 }
   0x3   :  { %v34_v8 = vstv %s33_s8 }
   0x4   :  { %v14_v3 = vadd.s32 128, %v13_v2  ;;  %v15_v4 = vadd.s32 256, %v13_v2  ;;  %v17_v5 = vmul.u32 512, %v11_v1  ;;  %v16_v29 = vadd.s32 384, %v13_v2 }
   0x6   :  { %v18_v6 = vadd.s32 %v17_v5, %v13_v2  ;;  %v19_v7 = vadd.s32 %v17_v5, %v14_v3  ;;  %v20_v9 = vadd.s32 %v17_v5, %v15_v4  ;;  %v21_v34 = vadd.s32 %v17_v5, %v16_v29 }
   0x7   :  { %v924_v29 = vmov 2102212464  }
   0x8   :  { %v29_v10 = vmul.u32 2654435769, %v18_v6  ;;  %v30_v11 = vmul.u32 2654435769, %v19_v7  ;;  %v31_v14 = vmul.u32 2654435769, %v20_v9 }
   0x9   :  { %v32_v39 = vmul.u32 2654435769, %v21_v34 }
   0xa   :  { %v35_v12 = vadd.s32 %v34_v8, %v29_v10  ;;  %v36_v13 = vadd.s32 %v34_v8, %v30_v11  ;;  %v37_v19 = vadd.s32 %v34_v8, %v31_v14 }
   0xb   :  { %v38_v44 = vadd.s32 %v34_v8, %v32_v39 }
   0xc   :  { %v75_v15 = vxor.u32 3668340011, %v35_v12  ;;  %v76_v16 = vxor.u32 3668340011, %v36_v13  ;;  %v77_v23 = vxor.u32 3668340011, %v37_v19 }
   0xd   :  { %v39_v45 = vxor.u32 1013904242, %v35_v12  ;;  %v40_v48 = vxor.u32 1013904242, %v36_v13  ;;  %v41_v49 = vxor.u32 1013904242, %v37_v19 }
   0xe   :  { %v79_v17 = vshrl.u32 %v75_v15, 16  ;;  %v80_v18 = vshrl.u32 %v76_v16, 16  ;;  %v81_v27 = vshrl.u32 %v77_v23, 16  ;;  %v42_v50 = vxor.u32 1013904242, %v38_v44 }
   0xf   :  { %v43_v53 = vshrl.u32 %v39_v45, 16  ;;  %v44_v56 = vshrl.u32 %v40_v48, 16  ;;  %v45_v57 = vshrl.u32 %v41_v49, 16  ;;  %v78_v62 = vxor.u32 3668340011, %v38_v44 }
  0x10   :  { %v83_v20 = vxor.u32 %v79_v17, %v75_v15  ;;  %v84_v21 = vxor.u32 %v80_v18, %v76_v16  ;;  %v85_v32 = vxor.u32 %v81_v27, %v77_v23  ;;  %v46_v58 = vshrl.u32 %v42_v50, 16 }
  0x11   :  { %v47_v61 = vxor.u32 %v43_v53, %v39_v45  ;;  %v48_v0 = vxor.u32 %v44_v56, %v40_v48  ;;  %v49_v1 = vxor.u32 %v45_v57, %v41_v49  ;;  %v82_v5 = vshrl.u32 %v78_v62, 16 }
  0x12   :  { %v87_v22 = vmul.u32 2146121005, %v83_v20  ;;  %v88_v25 = vmul.u32 2146121005, %v84_v21  ;;  %v89_v37 = vmul.u32 2146121005, %v85_v32  ;;  %v50_v2 = vxor.u32 %v46_v58, %v42_v50 }
  0x13   :  { %v51_v4 = vmul.u32 2146121005, %v47_v61  ;;  %v52_v9 = vmul.u32 2146121005, %v48_v0  ;;  %v53_v10 = vmul.u32 2146121005, %v49_v1  ;;  %v86_v15 = vxor.u32 %v82_v5, %v78_v62 }
  0x14   :  { %v91_v24 = vshrl.u32 %v87_v22, 15  ;;  %v92_v30 = vshrl.u32 %v88_v25, 15  ;;  %v93_v42 = vshrl.u32 %v89_v37, 15  ;;  %v54_v11 = vmul.u32 2146121005, %v50_v2 }
  0x15   :  { %v55_v14 = vshrl.u32 %v51_v4, 15  ;;  %v56_v19 = vshrl.u32 %v52_v9, 15  ;;  %v921_v21 = vmov 683565275   ;;  %v922_v23 = vmov 2475754826  }
  0x16   :  { %v95_v26 = vxor.u32 %v91_v24, %v87_v22  ;;  %v96_v35 = vxor.u32 %v92_v30, %v88_v25  ;;  %v97_v51 = vxor.u32 %v93_v42, %v89_v37  ;;  %v923_v27 = vmov 2131351028  }
  0x17   :  { %v90_v39 = vmul.u32 2146121005, %v86_v15  ;;  %v961_v44 = vxor.u32 %v55_v14, %v51_v4  ;;  %v965_v48 = vxor.u32 %v56_v19, %v52_v9 }
  0x18   :  { %v99_v28 = vmul.u32 2221713035, %v95_v26  ;;  %v100_v40 = vmul.u32 2221713035, %v96_v35  ;;  %v101_v59 = vmul.u32 2221713035, %v97_v51 }
  0x19   :  { %v57_v35 = vshrl.u32 %v53_v10, 15  ;;  %v94_v57 = vshrl.u32 %v90_v39, 15 }
  0x1a   :  { %v103_v31 = vshrl.u32 %v99_v28, 16  ;;  %v104_v46 = vshrl.u32 %v100_v40, 16  ;;  %v105_v3 = vshrl.u32 %v101_v59, 16 }
  0x1c   :  { %v107_v33 = vxor.u32 %v103_v31, %v99_v28  ;;  %v108_v54 = vxor.u32 %v104_v46, %v100_v40  ;;  %v109_v12 = vxor.u32 %v105_v3, %v101_v59  ;;  %v926_v46 = vmov 1326507024  }
  0x1d   :  { %v63_v59 = vmul.u32 2221713035, %v961_v44 }
  0x1e   :  { %v127_v36 = vshrl.u32 %v107_v33, 9  ;;  %v128_v63 = vshrl.u32 %v108_v54, 9  ;;  %v129_v20 = vshrl.u32 %v109_v12, 9  ;;  %v925_v33 = vmov 920167782  }
  0x20   :  { %v131_v38 = vor.u32 1065353216, %v127_v36  ;;  %v132_v7 = vor.u32 1065353216, %v128_v63  ;;  %v58_v36 = vshrl.u32 %v54_v11, 15  ;;  %v133_v49 = vor.u32 1065353216, %v129_v20 }
  0x22   :  { %v855_v41 = vadd.f32 -1.0, %v131_v38  ;;  %v856_v16 = vadd.f32 -1.0, %v132_v7  ;;  %v977_v56 = vxor.u32 %v58_v36, %v54_v11  ;;  %v857_v61 = vadd.f32 -1.0, %v133_v49 }
  0x24   :  { %v942_v43 = vmul.f32 6.2831855, %v855_v41  ;;  %v958_v37 = vmul.f32 6.2831855, %v856_v16  ;;  %v66_v9 = vmul.u32 2221713035, %v977_v56 }
  0x25   :  { %v1000_v12 = vmul.f32 6.2831855, %v857_v61 }
  0x26   :  { %v214_v47 = vand.u32 2139095040, %v942_v43  ;;  %v211_v8 = vand.u32 2147483647, %v942_v43 }
  0x28   :  { %v215_v52 = vshrl.u32 %v214_v47, 23  ;;  %v218_v17 = vand.u32 8388607, %v211_v8 }
  0x2a   :  { %v859_v55 = vadd.s32 4294967169, %v215_v52  ;;  %v219_v38 = vor.u32 8388608, %v218_v17  ;;  %v368_v52 = vand.u32 2139095040, %v958_v37 }
  0x2c   :  { %v221_v60 = vadd.s32 1, %v859_v55  ;;  %v969_v51 = vshll.u32 %v219_v38, 8  ;;  %v975_v55 = vxor.u32 %v57_v35, %v53_v10  ;;  %v369_v2 = vshrl.u32 %v368_v52, 23 }
  0x2d   :  { %v996_v10 = vxor.u32 %v94_v57, %v90_v39 }
  0x2e   :  { %vm222_vm0 = vcmp.gt.s32.totalorder %v221_v60, 0  ;;  %v260_v1 = vand.u32 65535, %v969_v51  ;;  %v261_v5 = vshrl.u32 %v969_v51, 16  ;;  %v65_v7 = vmul.u32 2221713035, %v975_v55 }
  0x2f   :  { %v223_v6 = vsel %vm222_vm0, %v221_v60, 0  ;;  %v64_v60 = vmul.u32 2221713035, %v965_v48  ;;  %v862_v19 = vadd.s32 4294967169, %v369_v2 }
  0x30   :  { %v225_v13 = vand.u32 31, %v223_v6  ;;  %v950_v25 = vshrl.u32 %v223_v6, 5 }
  0x32   :  { %v226_v18 = vsub.s32 32, %v225_v13  ;;  %v228_v22 = vshll.u32 %v921_v21, %v225_v13  ;;  %v231_v24 = vshll.u32 %v922_v23, %v225_v13  ;;  %v237_v30 = vshll.u32 %v924_v29, %v225_v13 }
  0x33   :  { %v234_v31 = vshll.u32 %v923_v27, %v225_v13  ;;  %v240_v42 = vshll.u32 %v925_v33, %v225_v13  ;;  %vm243_vm1 = vcmp.lt.s32.totalorder %v950_v25, 1  ;;  %vm246_vm2 = vcmp.lt.s32.totalorder %v950_v25, 4 }
  0x34   :  { %v229_v26 = vshrl.u32 %v922_v23, %v226_v18  ;;  %v232_v28 = vshrl.u32 %v923_v27, %v226_v18  ;;  %v235_v32 = vshrl.u32 %v924_v29, %v226_v18  ;;  %v238_v34 = vshrl.u32 %v925_v33, %v226_v18 }
  0x35   :  { %v241_v47 = vshrl.u32 %v926_v46, %v226_v18  ;;  %vm245_vm3 = vcmp.lt.s32.totalorder %v950_v25, 3  ;;  %vm244_vm4 = vcmp.lt.s32.totalorder %v950_v25, 2  ;;  %v227_v3 = vshrl.u32 %v921_v21, %v226_v18 }
  0x36   :  { %v230_v40 = vor.u32 %v229_v26, %v228_v22  ;;  %v233_v41 = vor.u32 %v232_v28, %v231_v24  ;;  %v239_v45 = vor.u32 %v238_v34, %v237_v30  ;;  %v236_v50 = vor.u32 %v235_v32, %v234_v31 }
  0x37   :  { %v242_v53 = vor.u32 %v241_v47, %v240_v42  ;;  %v365_v18 = vand.u32 2147483647, %v958_v37 }
  0x38   :  { %v251_v54 = vsel %vm243_vm1, %v230_v40, %v233_v41  ;;  %v252_v58 = vsel %vm246_vm2, %v239_v45, 920167782  ;;  %v255_v0 = vsel %vm243_vm1, %v233_v41, %v236_v50  ;;  %v248_v13 = vsel %vm246_vm2, %v236_v50, 2102212464 }
  0x39   :  { %v253_v62 = vsel %vm245_vm3, %v236_v50, %v252_v58  ;;  %v256_v4 = vsel %vm246_vm2, %v242_v53, 1326507024  ;;  %v247_v20 = vsel %vm243_vm1, %v227_v3, %v230_v40  ;;  %v249_v28 = vsel %vm245_vm3, %v233_v41, %v248_v13 }
  0x3a   :  { %v254_v63 = vsel %vm244_vm4, %v251_v54, %v253_v62  ;;  %v257_v11 = vsel %vm245_vm3, %v239_v45, %v256_v4  ;;  %v372_v45 = vand.u32 8388607, %v365_v18  ;;  %v250_v40 = vsel %vm244_vm4, %v247_v20, %v249_v28 }
  0x3b   :  { %v284_v6 = vand.u32 65535, %v254_v63  ;;  %v258_v14 = vsel %vm244_vm4, %v255_v0, %v257_v11  ;;  %v285_v15 = vshrl.u32 %v254_v63, 16  ;;  %v927_v50 = vmov 0  }
  0x3c   :  { %v262_v16 = vand.u32 65535, %v258_v14  ;;  %v263_v17 = vshrl.u32 %v258_v14, 16  ;;  %v375_v53 = vadd.s32 1, %v862_v19  ;;  %v304_v13 = vmul.u32 %v969_v51, %v250_v40 }
  0x3d   :  { %v286_v22 = vmul.u32 %v284_v6, %v260_v1  ;;  %v287_v24 = vmul.u32 %v285_v15, %v260_v1  ;;  %v288_v26 = vmul.u32 %v284_v6, %v261_v5  ;;  %v289_v34 = vmul.u32 %v285_v15, %v261_v5 }
  0x3e   :  { %v264_v30 = vmul.u32 %v262_v16, %v260_v1  ;;  %v265_v31 = vmul.u32 %v263_v17, %v260_v1  ;;  %v266_v32 = vmul.u32 %v262_v16, %v261_v5  ;;  %v267_v38 = vmul.u32 %v263_v17, %v261_v5 }
  0x3f   :  { %v290_v35 = vshll.u32 %v287_v24, 16  ;;  %v292_v36 = vshll.u32 %v288_v26, 16  ;;  %v291_v47 = vshrl.u32 %v287_v24, 16  ;;  %vm376_vm9 = vcmp.gt.s32.totalorder %v375_v53, 0 }
  0x40   :  { %v268_v39 = vshll.u32 %v265_v31, 16  ;;  %v270_v42 = vshll.u32 %v266_v32, 16  ;;  %v269_v54 = vshrl.u32 %v265_v31, 16  ;;  %v293_v63 = vshrl.u32 %v288_v26, 16 }
  0x41   :  { %vm294_vm5 = vc.u32 %v286_v22, %v290_v35  ;;  %v296_v49 = vadd.s32 %v290_v35, %v286_v22  ;;  %v377_v1 = vsel %vm376_vm9, %v375_v53, 0  ;;  %v271_v2 = vshrl.u32 %v266_v32, 16 }
  0x42   :  { %vm272_vm6 = vc.u32 %v264_v30, %v268_v39  ;;  %v274_v41 = vadd.s32 %v268_v39, %v264_v30  ;;  %v295_v52 = vsel %vm294_vm5, 1, %v927_v50  ;;  %v379_v4 = vand.u32 31, %v377_v1 }
  0x43   :  { %v273_v57 = vsel %vm272_vm6, 1, %v927_v50  ;;  %v297_v58 = vadd.s32 %v295_v52, %v289_v34  ;;  %vm298_vm7 = vc.u32 %v296_v49, %v292_v36  ;;  %v522_v5 = vand.u32 2139095040, %v1000_v12 }
  0x44   :  { %v275_v61 = vadd.s32 %v273_v57, %v267_v38  ;;  %vm276_vm8 = vc.u32 %v274_v41, %v270_v42  ;;  %v299_v62 = vsel %vm298_vm7, 1, %v927_v50  ;;  %v1020_v6 = vadd.s32 %v296_v49, %v292_v36 }
  0x45   :  { %v277_v25 = vsel %vm276_vm8, 1, %v927_v50  ;;  %v301_v0 = vadd.s32 %v299_v62, %v297_v58  ;;  %v373_v14 = vor.u32 8388608, %v372_v45  ;;  %v1023_v16 = vsub.s32 32, %v379_v4 }
  0x46   :  { %v279_v3 = vadd.s32 %v277_v25, %v275_v61  ;;  %v382_v17 = vshll.u32 %v921_v21, %v379_v4  ;;  %v385_v19 = vshll.u32 %v922_v23, %v379_v4  ;;  %v388_v22 = vshll.u32 %v923_v27, %v379_v4 }
  0x47   :  { %v302_v11 = vadd.s32 %v301_v0, %v291_v47  ;;  %v391_v24 = vshll.u32 %v924_v29, %v379_v4  ;;  %v394_v26 = vshll.u32 %v925_v33, %v379_v4  ;;  %v1032_v30 = vshrl.u32 %v377_v1, 5 }
  0x48   :  { %v280_v15 = vadd.s32 %v279_v3, %v269_v54  ;;  %v383_v51 = vshrl.u32 %v922_v23, %v1023_v16  ;;  %v386_v31 = vshrl.u32 %v923_v27, %v1023_v16  ;;  %v389_v34 = vshrl.u32 %v924_v29, %v1023_v16 }
  0x49   :  { %v303_v20 = vadd.s32 %v302_v11, %v293_v63  ;;  %v392_v35 = vshrl.u32 %v925_v33, %v1023_v16  ;;  %v395_v36 = vshrl.u32 %v926_v46, %v1023_v16  ;;  %v1050_v42 = vshll.u32 %v373_v14, 8 }
  0x4a   :  { %v1030_v28 = vadd.s32 %v280_v15, %v271_v2  ;;  %v1046_v38 = vor.u32 %v383_v51, %v382_v17  ;;  %v1048_v39 = vor.u32 %v386_v31, %v385_v19  ;;  %v390_v40 = vor.u32 %v389_v34, %v388_v22 }
  0x4b   :  { %v307_v32 = vadd.s32 1, %v303_v20  ;;  %v393_v47 = vor.u32 %v392_v35, %v391_v24  ;;  %v396_v49 = vor.u32 %v395_v36, %v394_v26  ;;  %v67_v41 = vshrl.u32 %v63_v59, 16 }
  0x4c   :  { %vm306_vm10 = vc.u32 %v1030_v28, %v1020_v6  ;;  %v68_v52 = vshrl.u32 %v64_v60, 16  ;;  %vm397_vm11 = vcmp.lt.s32.totalorder %v1032_v30, 1  ;;  %vm398_vm12 = vcmp.lt.s32.totalorder %v1032_v30, 2 }
  0x4d   :  { %v308_v45 = vsel %vm306_vm10, %v307_v32, %v303_v20  ;;  %vm399_vm13 = vcmp.lt.s32.totalorder %v1032_v30, 3  ;;  %vm400_vm14 = vcmp.lt.s32.totalorder %v1032_v30, 4  ;;  %v523_v54 = vshrl.u32 %v522_v5, 23 }
  0x4e   :  { %v309_v53 = vadd.s32 %v308_v45, %v304_v13  ;;  %v405_v58 = vsel %vm397_vm11, %v1046_v38, %v1048_v39  ;;  %v406_v61 = vsel %vm400_vm14, %v393_v47, 920167782  ;;  %v414_v62 = vand.u32 65535, %v1050_v42 }
  0x4f   :  { %v407_v25 = vsel %vm399_vm13, %v390_v40, %v406_v61  ;;  %v409_v63 = vsel %vm397_vm11, %v1048_v39, %v390_v40  ;;  %v410_v0 = vsel %vm400_vm14, %v396_v49, 1326507024  ;;  %v415_v1 = vshrl.u32 %v1050_v42, 16 }
  0x50   :  { %v310_v57 = vadd.s32 536870912, %v309_v53  ;;  %v69_v2 = vshrl.u32 %v65_v7, 16  ;;  %v408_v4 = vsel %vm398_vm12, %v405_v58, %v407_v25  ;;  %v411_v5 = vsel %vm399_vm13, %v393_v47, %v410_v0 }
  0x51   :  { %v70_v11 = vshrl.u32 %v66_v9, 16  ;;  %v412_v13 = vsel %vm398_vm12, %v409_v63, %v411_v5  ;;  %v438_v14 = vand.u32 65535, %v408_v4  ;;  %v439_v15 = vshrl.u32 %v408_v4, 16 }
  0x52   :  { %v1077_v3 = vshrl.u32 %v310_v57, 30  ;;  %v416_v19 = vand.u32 65535, %v412_v13  ;;  %v417_v20 = vshrl.u32 %v412_v13, 16  ;;  %v865_v22 = vadd.s32 4294967169, %v523_v54 }
  0x53   :  { %v71_v24 = vxor.u32 %v67_v41, %v63_v59  ;;  %v102_v26 = vmul.u32 2221713035, %v996_v10  ;;  %v441_v51 = vmul.u32 %v439_v15, %v414_v62  ;;  %v442_v31 = vmul.u32 %v438_v14, %v415_v1 }
  0x54   :  { %v312_v17 = vshll.u32 %v1077_v3, 30  ;;  %v72_v32 = vxor.u32 %v68_v52, %v64_v60  ;;  %v418_v35 = vmul.u32 %v416_v19, %v414_v62  ;;  %v419_v36 = vmul.u32 %v417_v20, %v414_v62 }
  0x55   :  { %v73_v45 = vxor.u32 %v69_v2, %v65_v7  ;;  %v420_v47 = vmul.u32 %v416_v19, %v415_v1  ;;  %v440_v49 = vmul.u32 %v438_v14, %v414_v62  ;;  %v444_v54 = vshll.u32 %v441_v51, 16 }
  0x56   :  { %v1093_v34 = vsub.s32 %v309_v53, %v312_v17  ;;  %v74_v44 = vxor.u32 %v70_v11, %v66_v9  ;;  %v421_v59 = vmul.u32 %v417_v20, %v415_v1  ;;  %v422_v41 = vshll.u32 %v419_v36, 16 }
  0x57   :  { %v529_v57 = vadd.s32 1, %v865_v22  ;;  %v424_v48 = vshll.u32 %v420_v47, 16  ;;  %v443_v60 = vmul.u32 %v439_v15, %v415_v1  ;;  %v446_v52 = vshll.u32 %v442_v31, 16 }
  0x58   :  { %v315_v58 = vsub.s32 0, %v1093_v34  ;;  %vm314_vm15 = vcmp.lt.s32.totalorder %v1093_v34, 0  ;;  %v381_v55 = vshrl.u32 %v921_v21, %v1023_v16  ;;  %vm426_vm0 = vc.u32 %v418_v35, %v422_v41 }
  0x59   :  { %v428_v7 = vadd.s32 %v422_v41, %v418_v35  ;;  %v402_v53 = vsel %vm400_vm14, %v390_v40, 2102212464  ;;  %v427_v56 = vsel %vm426_vm0, 1, %v927_v50  ;;  %vm448_vm1 = vc.u32 %v440_v49, %v444_v54 }
  0x5a   :  { %v450_v9 = vadd.s32 %v444_v54, %v440_v49  ;;  %v423_v61 = vshrl.u32 %v419_v36, 16  ;;  %v429_v62 = vadd.s32 %v427_v56, %v421_v59  ;;  %v449_v25 = vsel %vm448_vm1, 1, %v927_v50 }
  0x5b   :  { %vm430_vm2 = vc.u32 %v428_v7, %v424_v48  ;;  %v316_v63 = vsel %vm314_vm15, %v315_v58, %v1093_v34  ;;  %v451_v1 = vadd.s32 %v449_v25, %v443_v60  ;;  %v425_v16 = vshrl.u32 %v420_v47, 16 }
  0x5c   :  { %v431_v0 = vsel %vm430_vm2, 1, %v927_v50  ;;  %vm452_vm3 = vc.u32 %v450_v9, %v446_v52  ;;  %v445_v4 = vshrl.u32 %v441_v51, 16  ;;  %v111_v5 = vshrl.u32 %v71_v24, 9 }
  0x5d   :  { %v433_v2 = vadd.s32 %v431_v0, %v429_v62  ;;  %v453_v40 = vsel %vm452_vm3, 1, %v927_v50  ;;  %v401_v11 = vsel %vm397_vm11, %v381_v55, %v1046_v38  ;;  %v403_v13 = vsel %vm399_vm13, %v1048_v39, %v402_v53 }
  0x5e   :  { %v455_v14 = vadd.s32 %v453_v40, %v451_v1  ;;  %v317_v15 = vclz %v316_v63  ;;  %v447_v19 = vshrl.u32 %v442_v31, 16  ;;  %vm530_vm4 = vcmp.gt.s32.totalorder %v529_v57, 0 }
  0x5f   :  { %v434_v17 = vadd.s32 %v433_v2, %v423_v61  ;;  %v106_v20 = vshrl.u32 %v102_v26, 16  ;;  %v1118_v22 = vadd.s32 %v450_v9, %v446_v52  ;;  %v112_v51 = vshrl.u32 %v72_v32, 9 }
  0x60   :  { %v404_v24 = vsel %vm398_vm12, %v401_v11, %v403_v13  ;;  %v456_v38 = vadd.s32 %v455_v14, %v445_v4  ;;  %v113_v36 = vshrl.u32 %v73_v45, 9  ;;  %v114_v47 = vshrl.u32 %v74_v44, 9 }
  0x61   :  { %v1122_v35 = vadd.s32 %v434_v17, %v425_v16  ;;  %v115_v39 = vor.u32 1065353216, %v111_v5  ;;  %v531_v49 = vsel %vm530_vm4, %v529_v57, 0  ;;  %v860_v54 = vadd.s32 4294967294, %v317_v15 }
  0x62   :  { %v457_v59 = vadd.s32 %v456_v38, %v447_v19  ;;  %v519_v31 = vand.u32 2147483647, %v1000_v12  ;;  %v458_v41 = vmul.u32 %v1050_v42, %v404_v24  ;;  %v533_v32 = vand.u32 31, %v531_v49 }
  0x63   :  { %vm460_vm5 = vc.u32 %v1122_v35, %v1118_v22  ;;  %v110_v30 = vxor.u32 %v106_v20, %v102_v26  ;;  %v116_v58 = vor.u32 1065353216, %v112_v51  ;;  %v117_v60 = vor.u32 1065353216, %v113_v36 }
  0x64   :  { %v461_v48 = vadd.s32 1, %v457_v59  ;;  %v118_v45 = vor.u32 1065353216, %v114_v47  ;;  %v851_v44 = vadd.f32 -1.0, %v115_v39  ;;  %v1130_v52 = vsub.s32 32, %v533_v32 }
  0x65   :  { %vm861_vm6 = vcmp.lt.s32.totalorder %v860_v54, 0  ;;  %v526_v55 = vand.u32 8388607, %v519_v31  ;;  %v1134_v42 = vshrl.u32 %v531_v49, 5  ;;  %v536_v53 = vshll.u32 %v921_v21, %v533_v32 }
  0x66   :  { %v462_v57 = vsel %vm460_vm5, %v461_v48, %v457_v59  ;;  %v539_v10 = vshll.u32 %v922_v23, %v533_v32  ;;  %v545_v26 = vshll.u32 %v924_v29, %v533_v32  ;;  %v537_v56 = vshrl.u32 %v922_v23, %v1130_v52 }
  0x67   :  { %v463_v7 = vadd.s32 %v462_v57, %v458_v41  ;;  %v540_v9 = vshrl.u32 %v923_v27, %v1130_v52  ;;  %v542_v61 = vshll.u32 %v923_v27, %v533_v32  ;;  %v543_v62 = vshrl.u32 %v924_v29, %v1130_v52 }
  0x68   :  { %v852_v25 = vadd.f32 -1.0, %v116_v58  ;;  %v546_v0 = vshrl.u32 %v925_v33, %v1130_v52  ;;  %v548_v1 = vshll.u32 %v925_v33, %v533_v32  ;;  %v130_v16 = vshrl.u32 %v110_v30, 9 }
  0x69   :  { %v464_v63 = vadd.s32 536870912, %v463_v7  ;;  %v143_v2 = vsub.f32 1.0, %v851_v44  ;;  %v527_v4 = vor.u32 8388608, %v526_v55  ;;  %v549_v40 = vshrl.u32 %v926_v46, %v1130_v52 }
  0x6a   :  { %v1152_v5 = vsel %vm861_vm6, 0, %v860_v54  ;;  %v547_v13 = vor.u32 %v546_v0, %v545_v26  ;;  %vm554_vm7 = vcmp.lt.s32.totalorder %v1134_v42, 4  ;;  %v1157_v14 = vor.u32 %v537_v56, %v536_v53 }
  0x6b   :  { %v1154_v11 = vshrl.u32 %v464_v63, 30  ;;  %v1159_v15 = vor.u32 %v540_v9, %v539_v10  ;;  %v1161_v17 = vor.u32 %v543_v62, %v542_v61  ;;  %v550_v19 = vor.u32 %v549_v40, %v548_v1 }
  0x6c   :  { %v144_v20 = vsub.f32 1.0, %v852_v25  ;;  %vm551_vm8 = vcmp.lt.s32.totalorder %v1134_v42, 1  ;;  %vm553_vm9 = vcmp.lt.s32.totalorder %v1134_v42, 3  ;;  %v853_v24 = vadd.f32 -1.0, %v117_v60 }
  0x6d   :  { %v466_v51 = vshll.u32 %v1154_v11, 30  ;;  %v854_v38 = vadd.f32 -1.0, %v118_v45  ;;  %v560_v36 = vsel %vm554_vm7, %v547_v13, 920167782  ;;  %v1168_v47 = vshll.u32 %v527_v4, 8 }
  0x6e   :  { %879 = vlog2.f32 %v143_v2  ;;  %v325_v39 = vsub.s32 4294967266, %v1152_v5  ;;  %vm552_vm10 = vcmp.lt.s32.totalorder %v1134_v42, 2  ;;  %v559_v54 = vsel %vm551_vm8, %v1157_v14, %v1159_v15 }
  0x6f   :  { %v1171_v49 = vsub.s32 %v463_v7, %v466_v51  ;;  %v561_v59 = vsel %vm553_vm9, %v1161_v17, %v560_v36  ;;  %v563_v41 = vsel %vm551_vm8, %v1159_v15, %v1161_v17  ;;  %v564_v32 = vsel %vm554_vm7, %v550_v19, 1326507024 }
  0x70   :  { %v134_v30 = vor.u32 1065353216, %v130_v16  ;;  %881 = vlog2.f32 %v144_v20  ;;  %v305_v48 = vadd.s32 %v1020_v6, %v1030_v28  ;;  %v321_v60 = vsub.s32 32, %v1152_v5 }
  0x71   :  { %vm468_vm11 = vcmp.lt.s32.totalorder %v1171_v49, 0  ;;  %v469_v58 = vsub.s32 0, %v1171_v49  ;;  %v565_v45 = vsel %vm553_vm9, %v547_v13, %v564_v32  ;;  %v568_v44 = vand.u32 65535, %v1168_v47 }
  0x72   :  { %v326_v57 = vadd.s32 127, %v325_v39  ;;  %v562_v7 = vsel %vm552_vm10, %v559_v54, %v561_v59  ;;  %v566_v53 = vsel %vm552_vm10, %v563_v41, %v565_v45  ;;  %v569_v26 = vshrl.u32 %v1168_v47, 16 }
  0x73   :  { %v470_v55 = vsel %vm468_vm11, %v469_v58, %v1171_v49  ;;  %v570_v6 = vand.u32 65535, %v566_v53  ;;  %v571_v28 = vshrl.u32 %v566_v53, 16  ;;  %v858_v9 = vadd.f32 -1.0, %v134_v30 }
  0x74   :  { %v471_v10 = vclz %v470_v55  ;;  %v880_v56 = vpop.eup %879  ;;  %v145_v61 = vsub.f32 1.0, %v853_v24  ;;  %v146_v62 = vsub.f32 1.0, %v854_v38  ;;  %v593_v0 = vshrl.u32 %v562_v7, 16 }
  0x75   :  { %v573_v63 = vmul.u32 %v571_v28, %v568_v44  ;;  %v322_v16 = vshll.u32 %v1093_v34, %v1152_v5  ;;  %v323_v2 = vshrl.u32 %v305_v48, %v321_v60  ;;  %v327_v4 = vshll.u32 %v326_v57, 23 }
  0x76   :  { %v863_v25 = vadd.s32 4294967294, %v471_v10  ;;  %v882_v1 = vpop.eup %881  ;;  %v574_v40 = vmul.u32 %v570_v6, %v569_v26  ;;  %v592_v13 = vand.u32 65535, %v562_v7  ;;  %883 = vlog2.f32 %v145_v61 }
  0x77   :  { %v572_v20 = vmul.u32 %v570_v6, %v568_v44  ;;  %v576_v51 = vshll.u32 %v573_v63, 16  ;;  %885 = vlog2.f32 %v146_v62  ;;  %v1203_v36 = vmul.f32 6.2831855, %v858_v9 }
  0x78   :  { %vm864_vm12 = vcmp.lt.s32.totalorder %v863_v25, 0  ;;  %v595_v38 = vmul.u32 %v593_v0, %v568_v44  ;;  %v148_v39 = vmul.f32 0.6931472, %v880_v56  ;;  %v150_v54 = vmul.f32 0.6931472, %v882_v1 }
  0x79   :  { %v474_v19 = vsel %vm864_vm12, 0, %v863_v25  ;;  %v324_v59 = vor.u32 %v323_v2, %v322_v16  ;;  %v575_v41 = vmul.u32 %v571_v28, %v569_v26  ;;  %v328_v32 = vor.u32 4788187, %v327_v4 }
  0x7a   :  { %v479_v24 = vsub.s32 4294967266, %v474_v19  ;;  %v459_v34 = vadd.s32 %v1118_v22, %v1122_v35  ;;  %v578_v5 = vshll.u32 %v574_v40, 16  ;;  %v596_v30 = vmul.u32 %v592_v13, %v569_v26 }
  0x7b   :  { %v475_v58 = vsub.s32 32, %v474_v19  ;;  %vm580_vm13 = vc.u32 %v572_v20, %v576_v51  ;;  %v582_v60 = vadd.s32 %v576_v51, %v572_v20  ;;  %v535_v45 = vshrl.u32 %v921_v21, %v1130_v52 }
  0x7c   :  { %v480_v48 = vadd.s32 127, %v479_v24  ;;  %v581_v57 = vsel %vm580_vm13, 1, %v927_v50  ;;  %v594_v55 = vmul.u32 %v592_v13, %v568_v44  ;;  %v598_v7 = vshll.u32 %v595_v38, 16  ;;  %v884_v53 = vpop.eup %883 }
  0x7d   :  { %v331_v10 = vcvt.s32.f32 %v324_v59  ;;  %v577_v6 = vshrl.u32 %v573_v63, 16  ;;  %v583_v28 = vadd.s32 %v581_v57, %v575_v41  ;;  %vm584_vm14 = vc.u32 %v582_v60, %v578_v5  ;;  %v886_v56 = vpop.eup %885 }
  0x7e   :  { %v476_v22 = vshll.u32 %v1171_v49, %v474_v19  ;;  %v556_v35 = vsel %vm554_vm7, %v1161_v17, 2102212464  ;;  %v585_v9 = vsel %vm584_vm14, 1, %v927_v50  ;;  %v597_v61 = vmul.u32 %v593_v0, %v569_v26 }
  0x7f   :  { %v477_v52 = vshrl.u32 %v459_v34, %v475_v58  ;;  %v481_v62 = vshll.u32 %v480_v48, 23  ;;  %v587_v25 = vadd.s32 %v585_v9, %v583_v28  ;;  %v600_v44 = vshll.u32 %v596_v30, 16 }
  0x80   :  { %v329_v1 = vand.u32 2147483647, %v328_v32  ;;  %v555_v63 = vsel %vm551_vm8, %v535_v45, %v1157_v14  ;;  %vm602_vm15 = vc.u32 %v594_v55, %v598_v7  ;;  %v604_v16 = vadd.s32 %v598_v7, %v594_v55 }
  0x81   :  { %v579_v2 = vshrl.u32 %v574_v40, 16  ;;  %v588_v49 = vadd.s32 %v587_v25, %v577_v6  ;;  %v603_v4 = vsel %vm602_vm15, 1, %v927_v50  ;;  %v676_v17 = vand.u32 2139095040, %v1203_v36 }
  0x82   :  { %v557_v26 = vsel %vm553_vm9, %v1159_v15, %v556_v35  ;;  %v599_v0 = vshrl.u32 %v595_v38, 16  ;;  %v605_v13 = vadd.s32 %v603_v4, %v597_v61  ;;  %vm606_vm0 = vc.u32 %v604_v16, %v600_v44 }
  0x83   :  { %v478_v19 = vor.u32 %v477_v52, %v476_v22  ;;  %v482_v20 = vor.u32 4788187, %v481_v62  ;;  %v607_v51 = vsel %vm606_vm0, 1, %v927_v50  ;;  %v677_v14 = vshrl.u32 %v676_v17, 23 }
  0x84   :  { %v332_v24 = vmul.f32 %v331_v10, %v329_v1  ;;  %v601_v59 = vshrl.u32 %v596_v30, 16  ;;  %v609_v40 = vadd.s32 %v607_v51, %v605_v13  ;;  %v152_v41 = vmul.f32 0.6931472, %v884_v53 }
  0x85   :  { %v1224_v32 = vadd.s32 %v588_v49, %v579_v2  ;;  %v1226_v34 = vadd.s32 %v604_v16, %v600_v44  ;;  %v868_v5 = vadd.s32 4294967169, %v677_v14  ;;  %v154_v58 = vmul.f32 0.6931472, %v886_v56 }
  0x86   :  { %v1228_v48 = vmul.f32 -2.0, %v148_v39  ;;  %v558_v15 = vsel %vm552_vm10, %v555_v63, %v557_v26  ;;  %v610_v38 = vadd.s32 %v609_v40, %v599_v0  ;;  %v1232_v60 = vmul.f32 -2.0, %v150_v54 }
  0x87   :  { %v483_v45 = vand.u32 2147483647, %v482_v20  ;;  %v485_v57 = vcvt.s32.f32 %v478_v19  ;;  %v683_v55 = vadd.s32 1, %v868_v5  ;;  %vm213_vm1 = vcmp.lt.s32.totalorder %v942_v43, 0 }
  0x88   :  { %v333_v30 = vxor.u32 2147483648, %v332_v24  ;;  %v611_v7 = vadd.s32 %v610_v38, %v601_v59  ;;  %v1235_v53 = vmul.f32 -2.0, %v152_v41  ;;  %v612_v10 = vmul.u32 %v1168_v47, %v558_v15 }
  0x89   :  { %vm614_vm2 = vc.u32 %v1224_v32, %v1226_v34  ;;  %vm684_vm3 = vcmp.gt.s32.totalorder %v683_v55, 0  ;;  %v1240_v42 = vmul.f32 -2.0, %v154_v58  ;;  %887 = vrsqrt.f32 %v1228_v48 }
  0x8a   :  { %v615_v39 = vadd.s32 1, %v611_v7  ;;  %v685_v54 = vsel %vm684_vm3, %v683_v55, 0  ;;  %889 = vrsqrt.f32 %v1232_v60  ;;  %v486_v6 = vmul.f32 %v485_v57, %v483_v45 }
  0x8b   :  { %v687_v28 = vand.u32 31, %v685_v54  ;;  %vm1247_vm4 = vcmp.le.f32.partialorder %v211_v8, 0.7853982  ;;  %v334_v22 = vsel %vm213_vm1, %v333_v30, %v332_v24  ;;  %891 = vrsqrt.f32 %v1235_v53 }
  0x8c   :  { %v616_v35 = vsel %vm614_vm2, %v615_v39, %v611_v7  ;;  %v1517_v61 = vand.u32 2147483647, %v1203_v36  ;;  %893 = vrsqrt.f32 %v1240_v42  ;;  %vm367_vm5 = vcmp.lt.s32.totalorder %v958_v37, 0 }
  0x8d   :  { %v617_v9 = vadd.s32 %v616_v35, %v612_v10  ;;  %v1255_v52 = vsub.s32 32, %v687_v28  ;;  %v1264_v8 = vsel %vm1247_vm4, %v942_v43, %v334_v22  ;;  %vm1268_vm6 = vcmp.le.f32.partialorder %v365_v18, 0.7853982 }
  0x8e   :  { %v487_v1 = vxor.u32 2147483648, %v486_v6  ;;  %v690_v2 = vshll.u32 %v921_v21, %v687_v28  ;;  %v693_v4 = vshll.u32 %v922_v23, %v687_v28  ;;  %v680_v0 = vand.u32 8388607, %v1517_v61 }
  0x8f   :  { %v618_v63 = vadd.s32 536870912, %v617_v9  ;;  %v1272_v16 = vpop.eup %887  ;;  %v691_v49 = vshrl.u32 %v922_v23, %v1255_v52  ;;  %v694_v17 = vshrl.u32 %v923_v27, %v1255_v52  ;;  %v1286_v13 = vshrl.u32 %v685_v54, 5 }
  0x90   :  { %v1280_v26 = vpop.eup %889  ;;  %v699_v19 = vshll.u32 %v924_v29, %v687_v28  ;;  %v1291_v20 = vmul.f32 %v1264_v8, %v1264_v8  ;;  %v696_v23 = vshll.u32 %v923_v27, %v687_v28  ;;  %v697_v51 = vshrl.u32 %v924_v29, %v1255_v52 }
  0x91   :  { %v1282_v18 = vshrl.u32 %v618_v63, 30  ;;  %v700_v14 = vshrl.u32 %v925_v33, %v1255_v52  ;;  %v1298_v24 = vpop.eup %891  ;;  %v488_v59 = vsel %vm367_vm5, %v487_v1, %v486_v6  ;;  %v702_v41 = vshll.u32 %v925_v33, %v687_v28 }
  0x92   :  { %v703_v5 = vshrl.u32 %v926_v46, %v1255_v52  ;;  %v1306_v58 = vpop.eup %893  ;;  %v160_v27 = vmul.f32 %v1272_v16, %v1228_v48  ;;  %v172_v29 = vmul.f32 %v1280_v26, %v1232_v60  ;;  %v1312_v15 = vor.u32 %v691_v49, %v690_v2 }
  0x93   :  { %v620_v40 = vshll.u32 %v1282_v18, 30  ;;  %v1314_v38 = vor.u32 %v694_v17, %v693_v4  ;;  %v681_v57 = vor.u32 8388608, %v680_v0  ;;  %v701_v55 = vor.u32 %v700_v14, %v699_v19 }
  0x94   :  { %vm705_vm7 = vcmp.lt.s32.totalorder %v1286_v13, 1  ;;  %v347_v33 = vmul.f32 -0.00019511016, %v1291_v20  ;;  %v1321_v46 = vsel %vm1268_vm6, %v958_v37, %v488_v59  ;;  %v698_v30 = vor.u32 %v697_v51, %v696_v23 }
  0x95   :  { %v621_v45 = vsub.s32 %v617_v9, %v620_v40  ;;  %v704_v7 = vor.u32 %v703_v5, %v702_v41  ;;  %vm707_vm9 = vcmp.lt.s32.totalorder %v1286_v13, 3  ;;  %vm708_vm10 = vcmp.lt.s32.totalorder %v1286_v13, 4 }
  0x96   :  { %v1326_v39 = vmul.f32 %v1272_v16, %v160_v27  ;;  %v340_v54 = vmul.f32 -0.001358992, %v1291_v20  ;;  %vm706_vm11 = vcmp.lt.s32.totalorder %v1286_v13, 2  ;;  %v713_v6 = vsel %vm705_vm7, %v1312_v15, %v1314_v38 }
  0x97   :  { %vm622_vm8 = vcmp.lt.s32.totalorder %v621_v45, 0  ;;  %v623_v10 = vsub.s32 0, %v621_v45  ;;  %v1336_v28 = vmul.f32 %v1321_v46, %v1321_v46  ;;  %v714_v35 = vsel %vm708_vm10, %v701_v55, 920167782 }
  0x98   :  { %v1340_v9 = vshll.u32 %v681_v57, 8  ;;  %v1344_v1 = vmul.f32 %v1298_v24, %v1235_v53  ;;  %v715_v2 = vsel %vm707_vm9, %v698_v30, %v714_v35  ;;  %v717_v49 = vsel %vm705_vm7, %v1314_v38, %v698_v30 }
  0x99   :  { %v624_v22 = vsel %vm622_vm8, %v623_v10, %v621_v45  ;;  %v1352_v4 = vmul.f32 %v1280_v26, %v172_v29  ;;  %v348_v17 = vadd.f32 0.008332121, %v347_v33  ;;  %v716_v0 = vsel %vm706_vm11, %v713_v6, %v715_v2 }
  0x9a   :  { %v625_v63 = vclz %v624_v22  ;;  %v718_v19 = vsel %vm708_vm10, %v704_v7, 1326507024  ;;  %v1359_v51 = vadd.f32 0.041655596, %v340_v54  ;;  %v501_v40 = vmul.f32 -0.00019511016, %v1336_v28 }
  0x9b   :  { %v719_v59 = vsel %vm707_vm9, %v701_v55, %v718_v19  ;;  %v722_v5 = vand.u32 65535, %v1340_v9  ;;  %v747_v27 = vshrl.u32 %v716_v0, 16  ;;  %v613_v29 = vadd.s32 %v1226_v34, %v1224_v32 }
  0x9c   :  { %v866_v14 = vadd.s32 4294967294, %v625_v63  ;;  %v720_v41 = vsel %vm706_vm11, %v717_v49, %v719_v59  ;;  %v723_v57 = vshrl.u32 %v1340_v9, 16  ;;  %v349_v7 = vmul.f32 %v348_v17, %v1291_v20 }
  0x9d   :  { %v724_v33 = vand.u32 65535, %v720_v41  ;;  %v725_v54 = vshrl.u32 %v720_v41, 16  ;;  %v746_v55 = vand.u32 65535, %v716_v0  ;;  %v494_v6 = vmul.f32 -0.001358992, %v1336_v28 }
  0x9e   :  { %vm867_vm12 = vcmp.lt.s32.totalorder %v866_v14, 0  ;;  %v502_v2 = vadd.f32 0.008332121, %v501_v40  ;;  %v749_v59 = vmul.u32 %v747_v27, %v722_v5  ;;  %v689_v34 = vshrl.u32 %v921_v21, %v1255_v52 }
  0x9f   :  { %v628_v10 = vsel %vm867_vm12, 0, %v866_v14  ;;  %v726_v49 = vmul.u32 %v724_v33, %v722_v5  ;;  %v727_v19 = vmul.u32 %v725_v54, %v722_v5  ;;  %v728_v25 = vmul.u32 %v724_v33, %v723_v57 }
  0xa0   :  { %v629_v22 = vsub.s32 32, %v628_v10  ;;  %v630_v35 = vshll.u32 %v621_v45, %v628_v10  ;;  %v633_v63 = vsub.s32 4294967266, %v628_v10  ;;  %vm521_vm13 = vcmp.lt.s32.totalorder %v1000_v12, 0 }
  0xa1   :  { %v729_v17 = vmul.u32 %v725_v54, %v723_v57  ;;  %v730_v14 = vshll.u32 %v727_v19, 16  ;;  %v748_v0 = vmul.u32 %v746_v55, %v722_v5  ;;  %v750_v41 = vmul.u32 %v746_v55, %v723_v57 }
  0xa2   :  { %v631_v61 = vshrl.u32 %v613_v29, %v629_v22  ;;  %v634_v32 = vadd.s32 127, %v633_v63  ;;  %v710_v45 = vsel %vm708_vm10, %v698_v30, 2102212464  ;;  %v732_v40 = vshll.u32 %v728_v25, 16 }
  0xa3   :  { %vm734_vm14 = vc.u32 %v726_v49, %v730_v14  ;;  %v736_v10 = vadd.s32 %v730_v14, %v726_v49  ;;  %v751_v29 = vmul.u32 %v747_v27, %v723_v57  ;;  %v752_v22 = vshll.u32 %v749_v59, 16 }
  0xa4   :  { %v632_v62 = vor.u32 %v631_v61, %v630_v35  ;;  %v635_v56 = vshll.u32 %v634_v32, 23  ;;  %v735_v21 = vsel %vm734_vm14, 1, %v927_v50  ;;  %v754_v52 = vshll.u32 %v750_v41, 16 }
  0xa5   :  { %v731_v33 = vshrl.u32 %v727_v19, 16  ;;  %v737_v54 = vadd.s32 %v735_v21, %v729_v17  ;;  %vm738_vm15 = vc.u32 %v736_v10, %v732_v40  ;;  %vm756_vm0 = vc.u32 %v748_v0, %v752_v22 }
  0xa6   :  { %v636_v63 = vor.u32 4788187, %v635_v56  ;;  %v639_v23 = vcvt.s32.f32 %v632_v62  ;;  %v739_v61 = vsel %vm738_vm15, 1, %v927_v50  ;;  %v757_v55 = vsel %vm756_vm0, 1, %v927_v50 }
  0xa7   :  { %v758_v30 = vadd.s32 %v752_v22, %v748_v0  ;;  %v495_v35 = vadd.f32 0.041655596, %v494_v6  ;;  %v733_v32 = vshrl.u32 %v728_v25, 16  ;;  %v741_v49 = vadd.s32 %v739_v61, %v737_v54 }
  0xa8   :  { %v637_v5 = vand.u32 2147483647, %v636_v63  ;;  %v759_v27 = vadd.s32 %v757_v55, %v751_v29  ;;  %v503_v56 = vmul.f32 %v502_v2, %v1336_v28  ;;  %v753_v57 = vshrl.u32 %v749_v59, 16 }
  0xa9   :  { %vm760_vm2 = vc.u32 %v758_v30, %v754_v52  ;;  %v709_v19 = vsel %vm705_vm7, %v689_v34, %v1312_v15  ;;  %v711_v17 = vsel %vm707_vm9, %v1314_v38, %v710_v45  ;;  %v742_v14 = vadd.s32 %v741_v49, %v731_v33 }
  0xaa   :  { %v640_v62 = vmul.f32 %v639_v23, %v637_v5  ;;  %v761_v0 = vsel %vm760_vm2, 1, %v927_v50  ;;  %vm1390_vm3 = vcmp.le.f32.partialorder %v519_v31, 0.7853982  ;;  %v755_v6 = vshrl.u32 %v750_v41, 16 }
  0xab   :  { %v763_v2 = vadd.s32 %v761_v0, %v759_v27  ;;  %v162_v59 = vmul.f32 0.5, %v1326_v39  ;;  %v342_v15 = vmul.f32 %v1359_v51, %v1291_v20  ;;  %v1397_v34 = vadd.s32 %v742_v14, %v733_v32 }
  0xac   :  { %v641_v23 = vxor.u32 2147483648, %v640_v62  ;;  %v1399_v38 = vadd.s32 %v758_v30, %v754_v52  ;;  %v350_v45 = vadd.f32 -0.16666654, %v349_v7  ;;  %v712_v31 = vsel %vm706_vm11, %v709_v19, %v711_v17 }
  0xad   :  { %v764_v40 = vadd.s32 %v763_v2, %v753_v57  ;;  %v185_v41 = vmul.f32 %v1298_v24, %v1344_v1  ;;  %v496_v39 = vmul.f32 %v495_v35, %v1336_v28  ;;  %v504_v10 = vadd.f32 -0.16666654, %v503_v56 }
  0xae   :  { %v642_v50 = vsel %vm521_vm13, %v641_v23, %v640_v62  ;;  %v174_v7 = vmul.f32 0.5, %v1352_v4  ;;  %v1524_v29 = vsub.s32 4, %v1077_v3  ;;  %v343_v63 = vadd.f32 -0.4999988, %v342_v15 }
  0xaf   :  { %v1411_v51 = vsel %vm1390_vm3, %v1000_v12, %v642_v50  ;;  %v765_v1 = vadd.s32 %v764_v40, %v755_v6  ;;  %v489_v21 = vsub.s32 4, %v1154_v11  ;;  %v766_v52 = vmul.u32 %v1340_v9, %v712_v31 }
  0xb0   :  { %v336_v13 = vsel %vm213_vm1, %v1524_v29, %v1077_v3  ;;  %v647_v22 = vmul.f32 %v1411_v51, %v1411_v51  ;;  %vm768_vm7 = vc.u32 %v1397_v34, %v1399_v38  ;;  %v351_v4 = vmul.f32 %v350_v45, %v1291_v20 }
  0xb1   :  { %v769_v5 = vadd.s32 1, %v765_v1  ;;  %v163_v61 = vsub.f32 1.5, %v162_v59  ;;  %v497_v55 = vadd.f32 -0.4999988, %v496_v39  ;;  %v505_v3 = vmul.f32 %v504_v10, %v1336_v28 }
  0xb2   :  { %v648_v33 = vmul.f32 -0.001358992, %v647_v22  ;;  %v655_v54 = vmul.f32 -0.00019511016, %v647_v22  ;;  %v643_v30 = vsub.s32 4, %v1282_v18  ;;  %v186_v35 = vmul.f32 0.5, %v185_v41 }
  0xb3   :  { %v770_v27 = vsel %vm768_vm7, %v769_v5, %v765_v1  ;;  %v175_v56 = vsub.f32 1.5, %v174_v7  ;;  %v338_v9 = vsel %vm1247_vm4, 0, %v336_v13  ;;  %v344_v62 = vmul.f32 %v343_v63, %v1291_v20 }
  0xb4   :  { %v649_v32 = vadd.f32 0.041655596, %v648_v33  ;;  %v656_v49 = vadd.f32 0.008332121, %v655_v54  ;;  %v771_v57 = vadd.s32 %v770_v27, %v766_v52  ;;  %v352_v19 = vadd.f32 1.0, %v351_v4 }
  0xb5   :  { %v490_v17 = vsel %vm367_vm5, %v489_v21, %v1154_v11  ;;  %v498_v23 = vmul.f32 %v497_v55, %v1336_v28  ;;  %v506_v6 = vadd.f32 1.0, %v505_v3  ;;  %v644_v2 = vsel %vm521_vm13, %v643_v30, %v1282_v18 }
  0xb6   :  { %v650_v14 = vmul.f32 %v649_v32, %v647_v22  ;;  %v657_v0 = vmul.f32 %v656_v49, %v647_v22  ;;  %v772_v59 = vadd.s32 536870912, %v771_v57  ;;  %v164_v47 = vmul.f32 %v1272_v16, %v163_v61 }
  0xb7   :  { %v187_v15 = vsub.f32 1.5, %v186_v35  ;;  %v345_v50 = vadd.f32 1.0, %v344_v62  ;;  %v355_v31 = vand.u32 3, %v338_v9  ;;  %v492_v11 = vsel %vm1268_vm6, 0, %v490_v17 }
  0xb8   :  { %v651_v20 = vadd.f32 -0.4999988, %v650_v14  ;;  %v658_v45 = vadd.f32 -0.16666654, %v657_v0  ;;  %v1441_v40 = vshrl.u32 %v772_v59, 30  ;;  %vm166_vm1 = vcmp.eq.f32.partialorder %v1228_v48, inf }
  0xb9   :  { %vm178_vm4 = vcmp.eq.f32.partialorder %v1232_v60, inf  ;;  %v353_v28 = vmul.f32 %v352_v19, %v1264_v8  ;;  %v646_v18 = vsel %vm1390_vm3, 0, %v644_v2  ;;  %v176_v39 = vmul.f32 %v1280_v26, %v175_v56 }
  0xba   :  { %v652_v16 = vmul.f32 %v651_v20, %v647_v22  ;;  %v659_v41 = vmul.f32 %v658_v45, %v647_v22  ;;  %v499_v10 = vadd.f32 1.0, %v498_v23  ;;  %v507_v7 = vmul.f32 %v506_v6, %v1321_v46 }
  0xbb   :  { %v774_v44 = vshll.u32 %v1441_v40, 30  ;;  %v165_v29 = vmul.f32 %v164_v47, %v1228_v48  ;;  %vm190_vm5 = vcmp.eq.f32.partialorder %v1235_v53, inf  ;;  %v509_v13 = vand.u32 3, %v492_v11 }
  0xbc   :  { %v653_v1 = vadd.f32 1.0, %v652_v16  ;;  %v660_v63 = vadd.f32 1.0, %v659_v41  ;;  %v188_v8 = vmul.f32 %v1298_v24, %v187_v15  ;;  %vm357_vm6 = vcmp.eq.s32.totalorder %v355_v31, 0 }
  0xbd   :  { %v663_v25 = vand.u32 3, %v646_v18  ;;  %v775_v21 = vsub.s32 %v771_v57, %v774_v44  ;;  %vm168_vm8 = vcmp.eq.f32.partialorder %v1228_v48, 0.0  ;;  %vm180_vm9 = vcmp.eq.f32.partialorder %v1232_v60, 0.0 }
  0xbe   :  { %v358_v26 = vxor.u32 2147483648, %v353_v28  ;;  %vm360_vm10 = vcmp.eq.s32.totalorder %v355_v31, 2  ;;  %v361_v46 = vxor.u32 2147483648, %v345_v50  ;;  %v661_v22 = vmul.f32 %v660_v63, %v1411_v51 }
  0xbf   :  { %vm192_vm11 = vcmp.eq.f32.partialorder %v1235_v53, 0.0  ;;  %v512_v52 = vxor.u32 2147483648, %v507_v7  ;;  %v515_v4 = vxor.u32 2147483648, %v499_v10  ;;  %vm776_vm12 = vcmp.lt.s32.totalorder %v775_v21, 0 }
  0xc0   :  { %v777_v33 = vsub.s32 0, %v775_v21  ;;  %vm511_vm13 = vcmp.eq.s32.totalorder %v509_v13, 0  ;;  %vm514_vm14 = vcmp.eq.s32.totalorder %v509_v13, 2  ;;  %v666_v24 = vxor.u32 2147483648, %v661_v22 }
  0xc1   :  { %v669_v54 = vxor.u32 2147483648, %v653_v1  ;;  %v177_v5 = vmul.f32 %v176_v39, %v1232_v60  ;;  %vm665_vm15 = vcmp.eq.s32.totalorder %v663_v25, 0  ;;  %vm668_vm0 = vcmp.eq.s32.totalorder %v663_v25, 2 }
  0xc2   :  { %v778_v61 = vsel %vm776_vm12, %v777_v33, %v775_v21  ;;  %v189_v55 = vmul.f32 %v188_v8, %v1235_v53  ;;  %vm356_vm2 = vcmp.lt.s32.totalorder %v355_v31, 2  ;;  %vm510_vm3 = vcmp.lt.s32.totalorder %v509_v13, 2 }
  0xc3   :  { %v779_v51 = vclz %v778_v61  ;;  %v359_v3 = vsel %vm357_vm6, %v345_v50, %v358_v26  ;;  %v362_v30 = vsel %vm360_vm10, %v361_v46, %v353_v28  ;;  %v513_v35 = vsel %vm511_vm13, %v499_v10, %v512_v52 }
  0xc4   :  { %v516_v32 = vsel %vm514_vm14, %v515_v4, %v507_v7  ;;  %vm664_vm7 = vcmp.lt.s32.totalorder %v663_v25, 2  ;;  %v667_v49 = vsel %vm665_vm15, %v653_v1, %v666_v24  ;;  %v670_v27 = vsel %vm668_vm0, %v669_v54, %v661_v22 }
  0xc5   :  { %v869_v56 = vadd.s32 4294967294, %v779_v51  ;;  %v167_v9 = vsel %vm166_vm1, %v1228_v48, %v165_v29  ;;  %v179_v62 = vsel %vm178_vm4, %v1232_v60, %v177_v5  ;;  %vm354_vm12 = vweird.f32 %v942_v43 }
  0xc6   :  { %vm508_vm6 = vweird.f32 %v958_v37  ;;  %v363_v57 = vsel %vm356_vm2, %v359_v3, %v362_v30  ;;  %v517_v19 = vsel %vm510_vm3, %v513_v35, %v516_v32  ;;  %v767_v17 = vadd.s32 %v1399_v38, %v1397_v34 }
  0xc7   :  { %vm870_vm10 = vcmp.lt.s32.totalorder %v869_v56, 0  ;;  %v191_v14 = vsel %vm190_vm5, %v1235_v53, %v189_v55  ;;  %vm662_vm1 = vweird.f32 %v1000_v12  ;;  %v671_v0 = vsel %vm664_vm7, %v667_v49, %v670_v27 }
  0xc8   :  { %v782_v23 = vsel %vm870_vm10, 0, %v869_v56  ;;  %v1525_v43 = vand.u32 2147483648, %v1228_v48  ;;  %v1526_v47 = vand.u32 2147483648, %v1232_v60  ;;  %v364_v38 = vsel %vm354_vm12, nan, %v363_v57 }
  0xc9   :  { %v783_v6 = vsub.s32 32, %v782_v23  ;;  %v784_v2 = vshll.u32 %v775_v21, %v782_v23  ;;  %v787_v59 = vsub.s32 4294967266, %v782_v23  ;;  %v518_v15 = vsel %vm508_vm6, nan, %v517_v19 }
  0xca   :  { %v170_v37 = vsel %vm168_vm8, %v1525_v43, %v167_v9  ;;  %v182_v34 = vsel %vm180_vm9, %v1526_v47, %v179_v62  ;;  %v1527_v20 = vand.u32 2147483648, %v1235_v53  ;;  %v672_v45 = vsel %vm662_vm1, nan, %v671_v0 }
  0xcb   :  { %v785_v50 = vshrl.u32 %v767_v17, %v783_v6  ;;  %v788_v31 = vadd.s32 127, %v787_v59  ;;  %v827_v18 = vmul.f32 %v364_v38, %v170_v37  ;;  %v828_v48 = vmul.f32 %v518_v15, %v182_v34 }
  0xcc   :  { %v194_v12 = vsel %vm192_vm11, %v1527_v20, %v191_v14  ;;  %v196_v60 = vmul.f32 %v1306_v58, %v1240_v42  ;;  %vm675_vm4 = vcmp.lt.s32.totalorder %v1203_v36, 0  ;;  %v1528_v44 = vand.u32 2147483647, %v1203_v36 }
  0xcd   :  { %v786_v11 = vor.u32 %v785_v50, %v784_v2  ;;  %v789_v28 = vshll.u32 %v788_v31, 23  ;;  %v829_v16 = vmul.f32 %v672_v45, %v194_v12  ;;  %831 = vst [vmem:[#allocation3] sm:$0xff] %v827_v18  ;;  %v797_v8 = vsub.s32 4, %v1441_v40 }
  0xce   :  { %832 = vst [vmem:[#allocation3 + $0x8] sm:$0xff] %v828_v48  ;;  %v197_v53 = vmul.f32 %v1306_v58, %v196_v60  ;;  %vm1494_vm5 = vcmp.le.f32.partialorder %v1528_v44, 0.7853982  ;;  %vm202_vm8 = vcmp.eq.f32.partialorder %v1240_v42, inf  ;;  %v205_v27 = vand.u32 2147483648, %v1240_v42 }
  0xcf   :  { %v790_v41 = vor.u32 4788187, %v789_v28  ;;  %v793_v39 = vcvt.s32.f32 %v786_v11  ;;  %833 = vst [vmem:[#allocation3 + $0x10] sm:$0xff] %v829_v16  ;;  %v798_v52 = vsel %vm675_vm4, %v797_v8, %v1441_v40  ;;  %vm204_vm11 = vcmp.eq.f32.partialorder %v1240_v42, 0.0 }
  0xd0   :  { %v198_v63 = vmul.f32 0.5, %v197_v53  ;;  %v800_v24 = vsel %vm1494_vm5, 0, %v798_v52  ;;  %vm816_vm15 = vweird.f32 %v1203_v36 }
  0xd1   :  { %v791_v10 = vand.u32 2147483647, %v790_v41  ;;  %v817_v3 = vand.u32 3, %v800_v24 }
  0xd2   :  { %v199_v22 = vsub.f32 1.5, %v198_v63 }
  0xd3   :  { %v794_v7 = vmul.f32 %v793_v39, %v791_v10  ;;  %vm822_vm9 = vcmp.eq.s32.totalorder %v817_v3, 2  ;;  %vm819_vm13 = vcmp.eq.s32.totalorder %v817_v3, 0  ;;  %vm818_vm14 = vcmp.lt.s32.totalorder %v817_v3, 2 }
  0xd4   :  { %v200_v61 = vmul.f32 %v1306_v58, %v199_v22 }
  0xd5   :  { %v795_v13 = vxor.u32 2147483648, %v794_v7 }
  0xd6   :  { %v201_v32 = vmul.f32 %v200_v61, %v1240_v42 }
  0xd7   :  { %v796_v1 = vsel %vm675_vm4, %v795_v13, %v794_v7 }
  0xd8   :  { %v799_v25 = vsel %vm1494_vm5, %v1203_v36, %v796_v1  ;;  %v203_v62 = vsel %vm202_vm8, %v1240_v42, %v201_v32 }
  0xd9   :  { %v801_v21 = vmul.f32 %v799_v25, %v799_v25  ;;  %v206_v19 = vsel %vm204_vm11, %v205_v27, %v203_v62 }
  0xdb   :  { %v802_v26 = vmul.f32 -0.001358992, %v801_v21  ;;  %v809_v46 = vmul.f32 -0.00019511016, %v801_v21 }
  0xdd   :  { %v803_v4 = vadd.f32 0.041655596, %v802_v26  ;;  %v810_v33 = vadd.f32 0.008332121, %v809_v46 }
  0xdf   :  { %v804_v54 = vmul.f32 %v803_v4, %v801_v21  ;;  %v811_v5 = vmul.f32 %v810_v33, %v801_v21 }
  0xe1   :  { %v805_v55 = vadd.f32 -0.4999988, %v804_v54  ;;  %v812_v51 = vadd.f32 -0.16666654, %v811_v5 }
  0xe3   :  { %v806_v30 = vmul.f32 %v805_v55, %v801_v21  ;;  %v813_v35 = vmul.f32 %v812_v51, %v801_v21 }
  0xe5   :  { %v807_v49 = vadd.f32 1.0, %v806_v30  ;;  %v814_v40 = vadd.f32 1.0, %v813_v35 }
  0xe7   :  { %v815_v56 = vmul.f32 %v814_v40, %v799_v25  ;;  %v823_v9 = vxor.u32 2147483648, %v807_v49 }
  0xe9   :  { %v820_v58 = vxor.u32 2147483648, %v815_v56  ;;  %v824_v57 = vsel %vm822_vm9, %v823_v9, %v815_v56 }
  0xeb   :  { %v821_v17 = vsel %vm819_vm13, %v807_v49, %v820_v58 }
  0xec   :  { %v825_v14 = vsel %vm818_vm14, %v821_v17, %v824_v57 }
  0xed   :  { %v826_v0 = vsel %vm816_vm15, nan, %v825_v14 }
  0xee   :  { %v830_v23 = vmul.f32 %v826_v0, %v206_v19 }
  0xf0   :  { %834 = vst [vmem:[#allocation3 + $0x18] sm:$0xff] %v830_v23 }
  0xf1   :  { %845 = dma.vmem_to_hbm [thread:$0]  %s841_s9, 512, %s843_s12, [#allocation4]  }
  0xf2   :  { %919 = dma.done.wait [#allocation4], 512  }
  0xf3   :  { %920 = vsyncadd [#allocation4], 4294966784 }
  0xf4   :  { %850 = vsyncpa [#allocation4], 1 }

</bundles_post_ra>
